<compile_context>
chip_gen: v7x
topology: tpu7x:2x2x1
jax: 0.10.0
libtpu: 0.0.40
codegen_flags: <defaults>
</compile_context>

<pallas_src>
import functools

import jax
import jax.numpy as jnp
from jax.experimental import pallas as pl
from jax.experimental.pallas import tpu as pltpu


_LANE = 128


def _round_up(x: int, m: int) -> int:
    return ((x + m - 1) // m) * m


def _vmem_budget():
    """Return (planning budget for our buffers, vmem_limit_bytes), per generation."""
    kind = ""
    try:
        kind = jax.devices()[0].device_kind.lower()
    except Exception:
        pass
    if "v5 lite" in kind or "v5e" in kind or "v5litepod" in kind:
        # 128 MiB physical but the harshest HBM roofline; keep tiles big but modest.
        return 40 << 20, 64 << 20
    if "v6" in kind:
        # 128 MiB physical: big tiles are cheap, raise the scoped limit.
        return 80 << 20, 100 << 20
    # v7x (64 MiB physical, 32 MiB default scoped) or unknown: be conservative.
    return 36 << 20, 48 << 20


def _footprint_bytes(tm: int, n_pad: int, f_pad: int) -> int:
    """Conservative VMEM footprint for the fused kernel at a given tiling."""
    adj_b = 2 * tm * n_pad * 2          # adj row tile, double buffered, bf16
    x_b = 2 * n_pad * f_pad * 2         # features (constant index map), bf16
    w_b = 2 * f_pad * f_pad * 2         # one stacked-weight slice, double buffered
    scr_b = 2 * n_pad * f_pad * 2       # z + support scratch, bf16
    out_b = 2 * tm * f_pad * 4          # output row tile, f32
    return adj_b + x_b + w_b + scr_b + out_b


def _choose_tiling(n: int, f_pad: int, budget: int):
    """Pick (tm, n_pad).  Prefer tm == n_pad (adj DMA'd once, VMEM resident)."""
    n128 = _round_up(n, _LANE)
    if _footprint_bytes(n128, n128, f_pad) <= budget:
        return n128, n128
    for tm in (2048, 1024, 512, 256, 128):
        n_pad = _round_up(n, tm)
        if _footprint_bytes(tm, n_pad, f_pad) <= budget:
            return tm, n_pad
    # TODO(synk): graphs too large for the fused-z design would need a two-pass
    # (support to HBM) variant; out of scope for these shapes.
    return 128, _round_up(n, 128)


def _fused_kernel(adj_ref, x_ref, w_ref, out_ref, z_ref, support_ref, *,
                  n_layers: int):
    layer = pl.program_id(0)
    tile = pl.program_id(1)
    tm = adj_ref.shape[0]

    # Start of a layer: snapshot support = act(z @ w_layer) into VMEM.  z holds
    # the previous layer's full output (or x for layer 0); every row tile of
    # this layer reuses the snapshot, so later z updates don't interfere.
    @pl.when(tile == 0)
    def _new_layer():
        @pl.when(layer == 0)
        def _():
            z_ref[...] = x_ref[...]

        s = jnp.dot(z_ref[...], w_ref[0], preferred_element_type=jnp.float32)

        @pl.when(layer < n_layers - 1)          # active=True layers -> tanh (EUP)
        def _():
            support_ref[...] = jnp.tanh(s).astype(support_ref.dtype)

        @pl.when(layer == n_layers - 1)         # final layer: no activation
        def _():
            support_ref[...] = s.astype(support_ref.dtype)

    # output row tile = adj_tile @ support   (bf16 operands, f32 accumulate)
    out = jnp.dot(adj_ref[...], support_ref[...],
                  preferred_element_type=jnp.float32)

    # Feed the next layer in VMEM (z never round-trips HBM) ...
    row0 = pl.multiple_of(tile * tm, tm)
    z_ref[pl.ds(row0, tm), :] = out.astype(z_ref.dtype)
    # ... and the HBM output window (only the last layer's values survive).
    out_ref[...] = out.astype(out_ref.dtype)


def igae_encoder(x, adj, w1, w2, w3):
    """IGAE_encoder.forward: three fused GNN layers sharing one adjacency."""
    n, n_input = x.shape
    out_dims = (w1.shape[0], w2.shape[0], w3.shape[0])
    dims = (n_input,) + out_dims
    f_pad = max(_round_up(d, _LANE) for d in dims)

    budget, vmem_limit = _vmem_budget()
    tm, n_pad = _choose_tiling(n, f_pad, budget)
    n_tiles = n_pad // tm

    # Zero padding is mathematically safe end to end: padded feature columns /
    # weight rows contribute 0, tanh(0) = 0, padded adj rows/cols are 0.
    x_p = jnp.pad(x.astype(jnp.bfloat16),
                  ((0, n_pad - n), (0, f_pad - n_input)))
    adj_p = jnp.pad(adj.astype(jnp.bfloat16),
                    ((0, n_pad - n), (0, n_pad - n)))
    # Pre-transpose weights to [in, out] (canonical MXU orientation) and stack
    # so the per-layer weight tile is pipelined by the grid.
    w_all = jnp.stack([
        jnp.pad(w.astype(jnp.bfloat16).T,
                ((0, f_pad - w.shape[1]), (0, f_pad - w.shape[0])))
        for w in (w1, w2, w3)
    ])

    flops = sum(2 * n * dims[i] * dims[i + 1] + 2 * n * n * dims[i + 1]
                for i in range(3))
    adj_passes = 1 if n_tiles == 1 else 3
    bytes_accessed = (adj_passes * n_pad * n_pad * 2      # adj
                      + n_pad * f_pad * 2                 # x
                      + 3 * f_pad * f_pad * 2             # weights
                      + 3 * n_pad * f_pad * 4)            # output writebacks

    out = pl.pallas_call(
        functools.partial(_fused_kernel, n_layers=3),
        out_shape=jax.ShapeDtypeStruct((n_pad, f_pad), jnp.float32),
        grid=(3, n_tiles),
        in_specs=[
            pl.BlockSpec((tm, n_pad), lambda l, i: (i, 0)),          # adj row tile
            pl.BlockSpec((n_pad, f_pad), lambda l, i: (0, 0)),       # x (whole)
            pl.BlockSpec((1, f_pad, f_pad), lambda l, i: (l, 0, 0)),  # w[l], [in,out]
        ],
        out_specs=pl.BlockSpec((tm, f_pad), lambda l, i: (i, 0)),
        scratch_shapes=[
            pltpu.VMEM((n_pad, f_pad), jnp.bfloat16),   # z (layer-to-layer carry)
            pltpu.VMEM((n_pad, f_pad), jnp.bfloat16),   # support (per-layer)
        ],
        compiler_params=pltpu.CompilerParams(
            dimension_semantics=("arbitrary", "arbitrary"),
            vmem_limit_bytes=vmem_limit,
        ),
        cost_estimate=pl.CostEstimate(
            flops=flops,
            transcendentals=n * (out_dims[0] + out_dims[1]),
            bytes_accessed=bytes_accessed,
        ),
    )(adj_p, x_p, w_all)

    return out[:n, :out_dims[2]]


def xavier_uniform(key, shape, dtype=jnp.float32):
    # torch.nn.init.xavier_uniform_ on a (fan_out, fan_in) weight.
    fan_out, fan_in = shape
    limit = jnp.sqrt(6.0 / (fan_in + fan_out))
    return jax.random.uniform(key, shape, dtype, minval=-limit, maxval=limit)


if __name__ == "__main__":
    # Small shapes consistent with the module: N nodes, encoder dims.
    N = 64
    N_INPUT, ENC1, ENC2, ENC3 = 32, 48, 32, 16

    key = jax.random.PRNGKey(0)
    k_x, k_adj, k1, k2, k3 = jax.random.split(key, 5)

    x = jax.random.normal(k_x, (N, N_INPUT), dtype=jnp.float32)
    a = jax.random.uniform(k_adj, (N, N), dtype=jnp.float32)
    adj = (a + a.T) * 0.5
    adj = adj / jnp.sum(adj, axis=1, keepdims=True)

    w1 = xavier_uniform(k1, (ENC1, N_INPUT))
    w2 = xavier_uniform(k2, (ENC2, ENC1))
    w3 = xavier_uniform(k3, (ENC3, ENC2))

    encoder = jax.jit(igae_encoder)
    z_igae = encoder(x, adj, w1, w2, w3)
    jax.block_until_ready(z_igae)
    assert z_igae.shape == (N, ENC3)

    # Reference 1: bf16-matched (same casts as the kernel, XLA dots) -> tight.
    def _ref_layer_bf16(feats, adj_bf, w, active):
        s = jnp.dot(feats.astype(jnp.bfloat16), w.astype(jnp.bfloat16).T,
                    preferred_element_type=jnp.float32)
        if active:
            s = jnp.tanh(s)
        s = s.astype(jnp.bfloat16)
        return jnp.dot(adj_bf, s, preferred_element_type=jnp.float32)

    adj_bf = adj.astype(jnp.bfloat16)
    r = _ref_layer_bf16(x, adj_bf, w1, True)
    r = _ref_layer_bf16(r, adj_bf, w2, True)
    ref_bf16 = _ref_layer_bf16(r, adj_bf, w3, False)

    # Reference 2: full-precision PyTorch-equivalent -> loose (bf16 operands).
    rf = adj @ jnp.tanh(x @ w1.T)
    rf = adj @ jnp.tanh(rf @ w2.T)
    ref_f32 = adj @ (rf @ w3.T)

    assert jnp.allclose(z_igae, ref_bf16, atol=5e-3, rtol=5e-3)
    assert jnp.allclose(z_igae, ref_f32, atol=5e-2, rtol=5e-2)

    print("KERNEL_OK")
</pallas_src>

<mosaic_0001>
module attributes {stable_mosaic.version = 11 : i64} {
  func.func @_fused_kernel(%arg0: i32, %arg1: i32, %arg2: memref<128x128xbf16, #tpu.memory_space<vmem>>, %arg3: memref<128x128xbf16, #tpu.memory_space<vmem>>, %arg4: memref<1x128x128xbf16, #tpu.memory_space<vmem>>, %arg5: memref<128x128xf32, #tpu.memory_space<vmem>>, %arg6: memref<128x128xbf16, #tpu.memory_space<vmem>>, %arg7: memref<128x128xbf16, #tpu.memory_space<vmem>>) attributes {dimension_semantics = [#tpu.dimension_semantics<arbitrary>, #tpu.dimension_semantics<arbitrary>], iteration_bounds = array<i64: 3, 1>, scalar_prefetch = 0 : i64, scratch_operands = 2 : i64, tpu.core_type = #tpu.core_type<tc>, window_params = [{transform_indices = @transform_0, window_bounds = array<i64: 128, 128>}, {pipeline_mode = #tpu.pipeline_mode<synchronous>, transform_indices = @transform_1, window_bounds = array<i64: 128, 128>}, {transform_indices = @transform_2, window_bounds = array<i64: 1, 128, 128>}, {transform_indices = @transform_3, window_bounds = array<i64: 128, 128>}]} {
    %c0_i32 = arith.constant 0 : i32
    %0 = arith.cmpi eq, %arg1, %c0_i32 : i32
    %1 = arith.extui %0 : i1 to i32
    %c0_i32_0 = arith.constant 0 : i32
    %2 = arith.cmpi ne, %1, %c0_i32_0 : i32
    scf.if %2 {
      %c0_i32_7 = arith.constant 0 : i32
      %12 = arith.cmpi eq, %arg0, %c0_i32_7 : i32
      %13 = arith.extui %12 : i1 to i32
      %c0_i32_8 = arith.constant 0 : i32
      %14 = arith.cmpi ne, %13, %c0_i32_8 : i32
      scf.if %14 {
        %c0_18 = arith.constant 0 : index
        %c0_19 = arith.constant 0 : index
        %25 = vector.load %arg3[%c0_18, %c0_19] : memref<128x128xbf16, #tpu.memory_space<vmem>>, vector<128x128xbf16>
        %c0_20 = arith.constant 0 : index
        %c0_21 = arith.constant 0 : index
        %26 = vector.load %arg6[%c0_20, %c0_21] : memref<128x128xbf16, #tpu.memory_space<vmem>>, vector<128x128xbf16>
        tpu.vector_store %arg6[%c0_20, %c0_21], %25 {strides = array<i32>} : memref<128x128xbf16, #tpu.memory_space<vmem>>, vector<128x128xbf16>,
      } else {
      }
      %c0_9 = arith.constant 0 : index
      %c0_10 = arith.constant 0 : index
      %15 = vector.load %arg6[%c0_9, %c0_10] : memref<128x128xbf16, #tpu.memory_space<vmem>>, vector<128x128xbf16>
      %c0_11 = arith.constant 0 : index
      %c0_12 = arith.constant 0 : index
      %c0_13 = arith.constant 0 : index
      %16 = vector.load %arg4[%c0_11, %c0_12, %c0_13] : memref<1x128x128xbf16, #tpu.memory_space<vmem>>, vector<1x128x128xbf16>
      %17 = vector.shape_cast %16 : vector<1x128x128xbf16> to vector<128x128xbf16>
      %cst_14 = arith.constant dense<0.000000e+00> : vector<128x128xf32>
      %18 = tpu.matmul %15, %17, %cst_14 {dimension_numbers = #tpu.dot_dimension_numbers<[1], [0], [0], [1], [0, 0, 1, 1], [], []>} : vector<128x128xbf16>, vector<128x128xbf16>, vector<128x128xf32> -> vector<128x128xf32>
      %c2_i32 = arith.constant 2 : i32
      %19 = arith.cmpi slt, %arg0, %c2_i32 : i32
      %20 = arith.extui %19 : i1 to i32
      %c0_i32_15 = arith.constant 0 : i32
      %21 = arith.cmpi ne, %20, %c0_i32_15 : i32
      scf.if %21 {
        %25 = math.tanh %18 : vector<128x128xf32>
        %26 = arith.truncf %25 : vector<128x128xf32> to vector<128x128xbf16>
        %c0_18 = arith.constant 0 : index
        %c0_19 = arith.constant 0 : index
        %27 = vector.load %arg7[%c0_18, %c0_19] : memref<128x128xbf16, #tpu.memory_space<vmem>>, vector<128x128xbf16>
        tpu.vector_store %arg7[%c0_18, %c0_19], %26 {strides = array<i32>} : memref<128x128xbf16, #tpu.memory_space<vmem>>, vector<128x128xbf16>,
      } else {
      }
      %c2_i32_16 = arith.constant 2 : i32
      %22 = arith.cmpi eq, %arg0, %c2_i32_16 : i32
      %23 = arith.extui %22 : i1 to i32
      %c0_i32_17 = arith.constant 0 : i32
      %24 = arith.cmpi ne, %23, %c0_i32_17 : i32
      scf.if %24 {
        %25 = arith.truncf %18 : vector<128x128xf32> to vector<128x128xbf16>
        %c0_18 = arith.constant 0 : index
        %c0_19 = arith.constant 0 : index
        %26 = vector.load %arg7[%c0_18, %c0_19] : memref<128x128xbf16, #tpu.memory_space<vmem>>, vector<128x128xbf16>
        tpu.vector_store %arg7[%c0_18, %c0_19], %25 {strides = array<i32>} : memref<128x128xbf16, #tpu.memory_space<vmem>>, vector<128x128xbf16>,
      } else {
      }
    } else {
    }
    %c0 = arith.constant 0 : index
    %c0_1 = arith.constant 0 : index
    %3 = vector.load %arg2[%c0, %c0_1] : memref<128x128xbf16, #tpu.memory_space<vmem>>, vector<128x128xbf16>
    %c0_2 = arith.constant 0 : index
    %c0_3 = arith.constant 0 : index
    %4 = vector.load %arg7[%c0_2, %c0_3] : memref<128x128xbf16, #tpu.memory_space<vmem>>, vector<128x128xbf16>
    %cst = arith.constant dense<0.000000e+00> : vector<128x128xf32>
    %5 = tpu.matmul %3, %4, %cst {dimension_numbers = #tpu.dot_dimension_numbers<[1], [0], [0], [1], [0, 0, 1, 1], [], []>} : vector<128x128xbf16>, vector<128x128xbf16>, vector<128x128xf32> -> vector<128x128xf32>
    %c128_i32 = arith.constant 128 : i32
    %6 = arith.muli %arg1, %c128_i32 : i32
    %7 = tpu.assume_multiple %6, 128 : i32
    %8 = arith.truncf %5 : vector<128x128xf32> to vector<128x128xbf16>
    %9 = arith.index_cast %7 : i32 to index
    %c0_4 = arith.constant 0 : index
    %10 = vector.load %arg6[%9, %c0_4] : memref<128x128xbf16, #tpu.memory_space<vmem>>, vector<128x128xbf16>
    tpu.vector_store %arg6[%9, %c0_4], %8 {strides = array<i32>} : memref<128x128xbf16, #tpu.memory_space<vmem>>, vector<128x128xbf16>,
    %c0_5 = arith.constant 0 : index
    %c0_6 = arith.constant 0 : index
    %11 = vector.load %arg5[%c0_5, %c0_6] : memref<128x128xf32, #tpu.memory_space<vmem>>, vector<128x128xf32>
    tpu.vector_store %arg5[%c0_5, %c0_6], %5 {strides = array<i32>} : memref<128x128xf32, #tpu.memory_space<vmem>>, vector<128x128xf32>,
    return
  }
  func.func @transform_0(%arg0: i32, %arg1: i32) -> (i32, i32) {
    %c0_i32 = arith.constant 0 : i32
    %c0_i32_0 = arith.constant 0 : i32
    return %arg1, %c0_i32 : i32, i32
  }
  func.func @transform_1(%arg0: i32, %arg1: i32) -> (i32, i32) {
    %c0_i32 = arith.constant 0 : i32
    %c0_i32_0 = arith.constant 0 : i32
    %c0_i32_1 = arith.constant 0 : i32
    return %c0_i32, %c0_i32_0 : i32, i32
  }
  func.func @transform_2(%arg0: i32, %arg1: i32) -> (i32, i32, i32) {
    %c0_i32 = arith.constant 0 : i32
    %c0_i32_0 = arith.constant 0 : i32
    %c0_i32_1 = arith.constant 0 : i32
    return %arg0, %c0_i32, %c0_i32_0 : i32, i32, i32
  }
  func.func @transform_3(%arg0: i32, %arg1: i32) -> (i32, i32) {
    %c0_i32 = arith.constant 0 : i32
    %c0_i32_0 = arith.constant 0 : i32
    return %arg1, %c0_i32 : i32, i32
  }
}

</mosaic_0001>

<bundles_post_ra>
// kernel: igae_encoder.1
= control target key start
LH: loop header
LB: loop body
LE: loop exit
PB: predicated region body
PF: predicated region fallthrough
CT: control target
= control target key end

     0   :  { %s1056_s12 = smov 0   ;;  %s1058_s13 = smov 0   ;;  %s1263_s0 = inlined_call_operand.vmem [shape: bf16[128,128], index: 0, kind: input, shape index: {}]   ;;  %s1264_s1 = inlined_call_operand.vmem [shape: bf16[128,128], index: 1, kind: input, shape index: {}]   ;;  %s1265_s2 = inlined_call_operand.vmem [shape: bf16[3,128,128], index: 2, kind: input, shape index: {}]   ;;  %s1266_s3 = inlined_call_operand.vmem [shape: f32[128,128], index: 3, kind: output, shape index: {}]  }
   0x1   :  { %s1060_s14 = smov 0  }
   0x2 LB: > { %s25_s15 = sadd.s32 1, %s1030_s13  ;;  %p801_p0 = scmp.ge.s32.totalorder %s1034_s14, 1  ;;  %s1034_s14 = sphi %s1060_s14, %s13_s14   ;;  %s1030_s13 = sphi %s1058_s13, %s1268_s13   ;;  %s1026_s12 = sphi %s1056_s12, %s1267_s12  }
   0x3   : > { %p27_p1 = scmp.ge.s32.totalorder %s25_s15, 3  ;;  %p160_p2 = scmp.lt.s32.totalorder %s1034_s14, 4 }
   0x5   : > { %s1270_s15 = smov (%p27_p1, %s25_s15), 0  ;;  %p161_p3 = pnand %p801_p0, %p160_p2 }
   0x6   : > { %p195_p4 = scmp.lt.s32.totalorder (!%p161_p3), %s1026_s12, 2  ;;  %p804_p5 = scmp.ne.s32.totalorder (!%p161_p3), %s1026_s12, 0 }
   0x7   : > { %164 = sbr.rel (%p161_p3) target bundleno = 595 (0x253), region = 32 }
   0xe   : > { %s196_s16 = scalar_select %p195_p4, %s1026_s12, 2 }
   0xf   : > { %214 = sbr.rel (%p804_p5) target bundleno = 22 (0x16), region = 40  ;;  %v956_v0 = vld [vmem:[%s1264_s1] sm:$0xff] (!%p804_p5)   ;;  %v957_v1 = vld [vmem:[%s1264_s1 + $0x8] sm:$0xff] (!%p804_p5)   ;;  %v958_v2 = vld [vmem:[%s1264_s1 + $0x10] sm:$0xff] (!%p804_p5)  }
  0x10   : > { %s835_s17 = sshll.u32 %s196_s16, 6  ;;  %279 = vst [vmem:[#allocation2] sm:$0xff] (!%p804_p5), %v956_v0  ;;  %280 = vst [vmem:[#allocation2 + $0x8] sm:$0xff] (!%p804_p5), %v957_v1  ;;  %v959_v3 = vld [vmem:[%s1264_s1 + $0x18] sm:$0xff] (!%p804_p5)   ;;  %v960_v4 = vld [vmem:[%s1264_s1 + $0x20] sm:$0xff] (!%p804_p5)  }
  0x11   : > { %s1081_s20 = scalar_lea.vmem %s1265_s2, %s835_s17  ;;  %281 = vst [vmem:[#allocation2 + $0x10] sm:$0xff] (!%p804_p5), %v958_v2  ;;  %282 = vst [vmem:[#allocation2 + $0x18] sm:$0xff] (!%p804_p5), %v959_v3  ;;  %v961_v5 = vld [vmem:[%s1264_s1 + $0x28] sm:$0xff] (!%p804_p5)   ;;  %v962_v6 = vld [vmem:[%s1264_s1 + $0x30] sm:$0xff] (!%p804_p5)  }
  0x12   : > { %283 = vst [vmem:[#allocation2 + $0x20] sm:$0xff] (!%p804_p5), %v960_v4  ;;  %284 = vst [vmem:[#allocation2 + $0x28] sm:$0xff] (!%p804_p5), %v961_v5  ;;  %v963_v7 = vld [vmem:[%s1264_s1 + $0x38] sm:$0xff] (!%p804_p5)  }
  0x13   : > { %285 = vst [vmem:[#allocation2 + $0x30] sm:$0xff] (!%p804_p5), %v962_v6  ;;  %286 = vst [vmem:[#allocation2 + $0x38] sm:$0xff] (!%p804_p5), %v963_v7 }
  0x16 PF: > { %v964_v8 = vld [vmem:[%s1081_s20] sm:$0xff]   ;;  %v965_v9 = vld [vmem:[%s1081_s20 + $0x8] sm:$0xff]   ;;  %v966_v10 = vld [vmem:[%s1081_s20 + $0x10] sm:$0xff]   ;;  %p821_p6 = scmp.ge.s32.totalorder %s1026_s12, 2 }
  0x17   : > { %868 = vmatprep.subr.bf16.mxu0 %v964_v8  ;;  %v967_v11 = vld [vmem:[%s1081_s20 + $0x18] sm:$0xff]   ;;  %v287_v12 = vld [vmem:[#allocation2] sm:$0xff]  ;;  %v969_v14 = vld [vmem:[%s1081_s20 + $0x28] sm:$0xff]  }
  0x18   : > { %869 = vmatpush3.bf16.msra.mxu0 %v964_v8  ;;  %884 = vmatprep.mubr.bf16.mxu0 %v287_v12  ;;  %v968_v13 = vld [vmem:[%s1081_s20 + $0x20] sm:$0xff]   ;;  %v970_v15 = vld [vmem:[%s1081_s20 + $0x30] sm:$0xff]   ;;  %v971_v16 = vld [vmem:[%s1081_s20 + $0x38] sm:$0xff]  }
  0x19   : > { %870 = vmatprep.subr.bf16.mxu0 %v965_v9  ;;  %v288_v17 = vld [vmem:[#allocation2 + $0x8] sm:$0xff]  ;;  %v289_v18 = vld [vmem:[#allocation2 + $0x10] sm:$0xff]  ;;  %v290_v19 = vld [vmem:[#allocation2 + $0x18] sm:$0xff] }
  0x1a   : > { %v291_v20 = vld [vmem:[#allocation2 + $0x20] sm:$0xff]  ;;  %v292_v21 = vld [vmem:[#allocation2 + $0x28] sm:$0xff]  ;;  %v293_v22 = vld [vmem:[#allocation2 + $0x30] sm:$0xff] }
  0x1b   : > { %v294_v23 = vld [vmem:[#allocation2 + $0x38] sm:$0xff] }
  0x1c   : > { %871 = vmatpush3.bf16.msra.mxu0 %v965_v9 }
  0x1d   : > { %872 = vmatprep.subr.bf16.mxu0 %v966_v10 }
  0x20   : > { %873 = vmatpush3.bf16.msra.mxu0 %v966_v10 }
  0x21   : > { %874 = vmatprep.subr.bf16.mxu0 %v967_v11 }
  0x24   : > { %875 = vmatpush3.bf16.msra.mxu0 %v967_v11 }
  0x25   : > { %876 = vmatprep.subr.bf16.mxu0 %v968_v13 }
  0x28   : > { %877 = vmatpush3.bf16.msra.mxu0 %v968_v13 }
  0x29   : > { %878 = vmatprep.subr.bf16.mxu0 %v969_v14 }
  0x2c   : > { %879 = vmatpush3.bf16.msra.mxu0 %v969_v14 }
  0x2d   : > { %880 = vmatprep.subr.bf16.mxu0 %v970_v15 }
  0x30   : > { %881 = vmatpush3.bf16.msra.mxu0 %v970_v15 }
  0x31   : > { %882 = vmatprep.subr.bf16.mxu0 %v971_v16 }
  0x34   : > { %883 = vmatpush3.bf16.msra.mxu0 %v971_v16 }
  0x37   : > { %885 = vmatmul.mubr.bf16.vlgmr.msra.gmra.mrb[0].mxu0 %v288_v17 }
  0x38   : > { %888 = vmatprep.mubr.bf16.mxu0 %v289_v18 }
  0x3f   : > { %889 = vmatmul.mubr.bf16.gmra.mrb[4].mxu0 %v290_v19 }
  0x40   : > { %892 = vmatprep.mubr.bf16.mxu0 %v291_v20 }
  0x47   : > { %893 = vmatmul.mubr.bf16.gmra.mrb[8].mxu0 %v292_v21 }
  0x48   : > { %896 = vmatprep.mubr.bf16.mxu0 %v293_v22 }
  0x4f   : > { %897 = vmatmul.mubr.bf16.gmra.mrb[12].mxu0 %v294_v23 }
 0x10a   : > { %v1116_v24 = vpop.f32.mrb[0].mxu0 }
 0x10b   : > { %v1118_v25 = vpop.f32.mrb[1].mxu0 }
 0x10c   : > { %v1120_v26 = vpop.f32.mrb[2].mxu0  ;;  %972 = vtanh.f32 (!%p821_p6), %v1118_v25 }
 0x10d   : > { %v1122_v27 = vpop.f32.mrb[3].mxu0 }
 0x10e   : > { %974 = vtanh.f32 (!%p821_p6), %v1122_v27 }
 0x10f   : > { %976 = vtanh.f32 (!%p821_p6), %v1116_v24 }
 0x110   : > { %978 = vtanh.f32 (!%p821_p6), %v1120_v26 }
 0x112   : > { %v1124_v28 = vpop.f32.mrb[4].mxu0 }
 0x113   : > { %v1126_v29 = vpop.f32.mrb[5].mxu0 }
 0x114   : > { %v1128_v30 = vpop.f32.mrb[6].mxu0  ;;  %980 = vtanh.f32 (!%p821_p6), %v1126_v29 }
 0x115   : > { %v1130_v31 = vpop.f32.mrb[7].mxu0 }
 0x116   : > { %982 = vtanh.f32 (!%p821_p6), %v1130_v31  ;;  %v973_v40 = vpop.eup (!%p821_p6), %972 }
 0x117   : > { %984 = vtanh.f32 (!%p821_p6), %v1124_v28 }
 0x118   : > { %986 = vtanh.f32 (!%p821_p6), %v1128_v30  ;;  %v975_v41 = vpop.eup (!%p821_p6), %974 }
 0x119   : > { %v977_v42 = vpop.eup (!%p821_p6), %976  ;;  %v476_v43 = vpack.c.bf16 (!%p821_p6), %v975_v41, %v973_v40 }
 0x11a   : > { %v1132_v32 = vpop.f32.mrb[8].mxu0  ;;  %v979_v44 = vpop.eup (!%p821_p6), %978 }
 0x11b   : > { %v1134_v33 = vpop.f32.mrb[9].mxu0  ;;  %484 = vst [vmem:[#allocation3] sm:$0xff] (!%p821_p6), %v476_v43  ;;  %v477_v46 = vpack.c.bf16 (!%p821_p6), %v979_v44, %v977_v42 }
 0x11c   : > { %v1136_v34 = vpop.f32.mrb[10].mxu0  ;;  %988 = vtanh.f32 (!%p821_p6), %v1134_v33 }
 0x11d   : > { %v1138_v35 = vpop.f32.mrb[11].mxu0  ;;  %485 = vst [vmem:[#allocation3 + $0x8] sm:$0xff] (!%p821_p6), %v477_v46 }
 0x11e   : > { %990 = vtanh.f32 (!%p821_p6), %v1138_v35  ;;  %v981_v45 = vpop.eup (!%p821_p6), %980 }
 0x11f   : > { %459 = sbr.rel (%p821_p6) target bundleno = 310 (0x136), region = 44  ;;  %992 = vtanh.f32 (!%p821_p6), %v1132_v32 }
 0x120   : > { %994 = vtanh.f32 (!%p821_p6), %v1136_v34  ;;  %v983_v47 = vpop.eup (!%p821_p6), %982 }
 0x121   : > { %v985_v48 = vpop.eup (!%p821_p6), %984  ;;  %v478_v49 = vpack.c.bf16 (!%p821_p6), %v983_v47, %v981_v45 }
 0x122   : > { %v1140_v36 = vpop.f32.mrb[12].mxu0  ;;  %v987_v50 = vpop.eup (!%p821_p6), %986 }
 0x123   : > { %v1142_v37 = vpop.f32.mrb[13].mxu0  ;;  %486 = vst [vmem:[#allocation3 + $0x10] sm:$0xff] (!%p821_p6), %v478_v49  ;;  %v479_v52 = vpack.c.bf16 (!%p821_p6), %v987_v50, %v985_v48 }
 0x124   : > { %v1144_v38 = vpop.f32.mrb[14].mxu0  ;;  %996 = vtanh.f32 (!%p821_p6), %v1142_v37 }
 0x125   : > { %v1146_v39 = vpop.f32.mrb[15].mxu0  ;;  %487 = vst [vmem:[#allocation3 + $0x18] sm:$0xff] (!%p821_p6), %v479_v52 }
 0x126   : > { %998 = vtanh.f32 %v1146_v39  ;;  %v989_v51 = vpop.eup %988 }
 0x127   : > { %1000 = vtanh.f32 %v1140_v36 }
 0x128   : > { %1002 = vtanh.f32 %v1144_v38  ;;  %v991_v53 = vpop.eup %990 }
 0x129   : > { %v993_v54 = vpop.eup %992  ;;  %v480_v55 = vpack.c.bf16 %v991_v53, %v989_v51 }
 0x12a   : > { %v995_v56 = vpop.eup %994 }
 0x12b   : > { %488 = vst [vmem:[#allocation3 + $0x20] sm:$0xff] %v480_v55  ;;  %v481_v58 = vpack.c.bf16 %v995_v56, %v993_v54 }
 0x12d   : > { %489 = vst [vmem:[#allocation3 + $0x28] sm:$0xff] %v481_v58 }
 0x12e   : > { %v997_v57 = vpop.eup %996 }
 0x130   : > { %v999_v59 = vpop.eup %998 }
 0x131   : > { %v1001_v60 = vpop.eup %1000  ;;  %v482_v61 = vpack.c.bf16 %v999_v59, %v997_v57 }
 0x132   : > { %v1003_v62 = vpop.eup %1002 }
 0x133   : > { %490 = vst [vmem:[#allocation3 + $0x30] sm:$0xff] %v482_v61  ;;  %v483_v63 = vpack.c.bf16 %v1003_v62, %v1001_v60 }
 0x135   : > { %491 = vst [vmem:[#allocation3 + $0x38] sm:$0xff] %v483_v63 }
 0x136 PF: > { %p822_p7 = scmp.ne.s32.totalorder %s1026_s12, 2 }
 0x137   : > { %v496_v0 = vpack.c.bf16 (!%p822_p7), %v1122_v27, %v1118_v25  ;;  %v497_v1 = vpack.c.bf16 (!%p822_p7), %v1120_v26, %v1116_v24  ;;  %v498_v2 = vpack.c.bf16 (!%p822_p7), %v1130_v31, %v1126_v29  ;;  %v499_v3 = vpack.c.bf16 (!%p822_p7), %v1128_v30, %v1124_v28 }
 0x138   : > { %495 = sbr.rel (%p822_p7) target bundleno = 319 (0x13f), region = 48  ;;  %v500_v4 = vpack.c.bf16 (!%p822_p7), %v1138_v35, %v1134_v33  ;;  %v501_v5 = vpack.c.bf16 (!%p822_p7), %v1136_v34, %v1132_v32  ;;  %v502_v6 = vpack.c.bf16 (!%p822_p7), %v1146_v39, %v1142_v37  ;;  %v503_v7 = vpack.c.bf16 (!%p822_p7), %v1144_v38, %v1140_v36 }
 0x139   : > { %504 = vst [vmem:[#allocation3] sm:$0xff] (!%p822_p7), %v496_v0  ;;  %505 = vst [vmem:[#allocation3 + $0x8] sm:$0xff] (!%p822_p7), %v497_v1 }
 0x13a   : > { %506 = vst [vmem:[#allocation3 + $0x10] sm:$0xff] (!%p822_p7), %v498_v2  ;;  %507 = vst [vmem:[#allocation3 + $0x18] sm:$0xff] (!%p822_p7), %v499_v3 }
 0x13b   : > { %508 = vst [vmem:[#allocation3 + $0x20] sm:$0xff] (!%p822_p7), %v500_v4  ;;  %509 = vst [vmem:[#allocation3 + $0x28] sm:$0xff] (!%p822_p7), %v501_v5 }
 0x13c   : > { %510 = vst [vmem:[#allocation3 + $0x30] sm:$0xff] (!%p822_p7), %v502_v6  ;;  %511 = vst [vmem:[#allocation3 + $0x38] sm:$0xff] (!%p822_p7), %v503_v7 }
 0x13f PF: > { %v1004_v10 = vld [vmem:[%s1263_s0] sm:$0xff]   ;;  %v1005_v17 = vld [vmem:[%s1263_s0 + $0x8] sm:$0xff]   ;;  %v1006_v18 = vld [vmem:[%s1263_s0 + $0x10] sm:$0xff]  }
 0x140   : > { %v528_v8 = vld [vmem:[#allocation3] sm:$0xff]  ;;  %v529_v9 = vld [vmem:[#allocation3 + $0x8] sm:$0xff]  ;;  %916 = vmatprep.mubr.bf16.mxu1 %v1004_v10  ;;  %v1007_v19 = vld [vmem:[%s1263_s0 + $0x18] sm:$0xff]  }
 0x141   : > { %900 = vmatprep.subr.bf16.mxu1 %v528_v8  ;;  %v530_v11 = vld [vmem:[#allocation3 + $0x10] sm:$0xff]  ;;  %v531_v12 = vld [vmem:[#allocation3 + $0x18] sm:$0xff]  ;;  %v1008_v20 = vld [vmem:[%s1263_s0 + $0x20] sm:$0xff]  }
 0x142   : > { %901 = vmatpush3.bf16.msra.mxu1 %v528_v8  ;;  %v532_v13 = vld [vmem:[#allocation3 + $0x20] sm:$0xff]  ;;  %v533_v14 = vld [vmem:[#allocation3 + $0x28] sm:$0xff]  ;;  %v1010_v22 = vld [vmem:[%s1263_s0 + $0x30] sm:$0xff]  }
 0x143   : > { %902 = vmatprep.subr.bf16.mxu1 %v529_v9  ;;  %v534_v15 = vld [vmem:[#allocation3 + $0x30] sm:$0xff]  ;;  %v535_v16 = vld [vmem:[#allocation3 + $0x38] sm:$0xff]  ;;  %v1009_v21 = vld [vmem:[%s1263_s0 + $0x28] sm:$0xff]  }
 0x144   : > { %v1011_v23 = vld [vmem:[%s1263_s0 + $0x38] sm:$0xff]  }
 0x146   : > { %903 = vmatpush3.bf16.msra.mxu1 %v529_v9 }
 0x147   : > { %904 = vmatprep.subr.bf16.mxu1 %v530_v11 }
 0x14a   : > { %905 = vmatpush3.bf16.msra.mxu1 %v530_v11 }
 0x14b   : > { %906 = vmatprep.subr.bf16.mxu1 %v531_v12 }
 0x14e   : > { %907 = vmatpush3.bf16.msra.mxu1 %v531_v12 }
 0x14f   : > { %908 = vmatprep.subr.bf16.mxu1 %v532_v13 }
 0x152   : > { %909 = vmatpush3.bf16.msra.mxu1 %v532_v13 }
 0x153   : > { %910 = vmatprep.subr.bf16.mxu1 %v533_v14 }
 0x156   : > { %911 = vmatpush3.bf16.msra.mxu1 %v533_v14 }
 0x157   : > { %912 = vmatprep.subr.bf16.mxu1 %v534_v15 }
 0x15a   : > { %913 = vmatpush3.bf16.msra.mxu1 %v534_v15 }
 0x15b   : > { %914 = vmatprep.subr.bf16.mxu1 %v535_v16 }
 0x15e   : > { %915 = vmatpush3.bf16.msra.mxu1 %v535_v16 }
 0x161   : > { %917 = vmatmul.mubr.bf16.vlgmr.msra.gmra.mrb[0].mxu1 %v1005_v17 }
 0x162   : > { %920 = vmatprep.mubr.bf16.mxu1 %v1006_v18 }
 0x169   : > { %921 = vmatmul.mubr.bf16.gmra.mrb[4].mxu1 %v1007_v19 }
 0x16a   : > { %924 = vmatprep.mubr.bf16.mxu1 %v1008_v20 }
 0x171   : > { %925 = vmatmul.mubr.bf16.gmra.mrb[8].mxu1 %v1009_v21 }
 0x172   : > { %928 = vmatprep.mubr.bf16.mxu1 %v1010_v22 }
 0x179   : > { %929 = vmatmul.mubr.bf16.gmra.mrb[12].mxu1 %v1011_v23 }
 0x234   : > { %v918_v24 = vpop.f32.mrb[0].mxu1 }
 0x235   : > { %704 = vst [vmem:[%s1266_s3 + $0x10] sm:$0xff] %v918_v24  ;;  %v618_v25 = vpop.f32.mrb[1].mxu1 }
 0x236   : > { %702 = vst [vmem:[%s1266_s3] sm:$0xff] %v618_v25  ;;  %v919_v26 = vpop.f32.mrb[2].mxu1 }
 0x237   : > { %v683_v27 = vpack.c.bf16 %v919_v26, %v918_v24  ;;  %705 = vst [vmem:[%s1266_s3 + $0x18] sm:$0xff] %v919_v26  ;;  %v621_v28 = vpop.f32.mrb[3].mxu1 }
 0x238   : > { %v682_v29 = vpack.c.bf16 %v621_v28, %v618_v25  ;;  %703 = vst [vmem:[%s1266_s3 + $0x8] sm:$0xff] %v621_v28 }
 0x239   : > { %695 = vst [vmem:[#allocation2 + $0x8] sm:$0xff] %v683_v27 }
 0x23a   : > { %694 = vst [vmem:[#allocation2] sm:$0xff] %v682_v29 }
 0x23c   : > { %v922_v30 = vpop.f32.mrb[4].mxu1 }
 0x23d   : > { %708 = vst [vmem:[%s1266_s3 + $0x30] sm:$0xff] %v922_v30  ;;  %v634_v31 = vpop.f32.mrb[5].mxu1 }
 0x23e   : > { %706 = vst [vmem:[%s1266_s3 + $0x20] sm:$0xff] %v634_v31  ;;  %v923_v32 = vpop.f32.mrb[6].mxu1 }
 0x23f   : > { %v685_v33 = vpack.c.bf16 %v923_v32, %v922_v30  ;;  %709 = vst [vmem:[%s1266_s3 + $0x38] sm:$0xff] %v923_v32  ;;  %v637_v34 = vpop.f32.mrb[7].mxu1 }
 0x240   : > { %v684_v35 = vpack.c.bf16 %v637_v34, %v634_v31  ;;  %707 = vst [vmem:[%s1266_s3 + $0x28] sm:$0xff] %v637_v34 }
 0x241   : > { %697 = vst [vmem:[#allocation2 + $0x18] sm:$0xff] %v685_v33 }
 0x242   : > { %696 = vst [vmem:[#allocation2 + $0x10] sm:$0xff] %v684_v35 }
 0x244   : > { %v926_v36 = vpop.f32.mrb[8].mxu1 }
 0x245   : > { %712 = vst [vmem:[%s1266_s3 + $0x50] sm:$0xff] %v926_v36  ;;  %v650_v37 = vpop.f32.mrb[9].mxu1 }
 0x246   : > { %710 = vst [vmem:[%s1266_s3 + $0x40] sm:$0xff] %v650_v37  ;;  %v927_v38 = vpop.f32.mrb[10].mxu1 }
 0x247   : > { %v687_v39 = vpack.c.bf16 %v927_v38, %v926_v36  ;;  %713 = vst [vmem:[%s1266_s3 + $0x58] sm:$0xff] %v927_v38  ;;  %v653_v40 = vpop.f32.mrb[11].mxu1 }
 0x248   : > { %v686_v41 = vpack.c.bf16 %v653_v40, %v650_v37  ;;  %711 = vst [vmem:[%s1266_s3 + $0x48] sm:$0xff] %v653_v40 }
 0x249   : > { %699 = vst [vmem:[#allocation2 + $0x28] sm:$0xff] %v687_v39 }
 0x24a   : > { %698 = vst [vmem:[#allocation2 + $0x20] sm:$0xff] %v686_v41 }
 0x24c   : > { %v930_v42 = vpop.f32.mrb[12].mxu1 }
 0x24d   : > { %716 = vst [vmem:[%s1266_s3 + $0x70] sm:$0xff] %v930_v42  ;;  %v666_v43 = vpop.f32.mrb[13].mxu1 }
 0x24e   : > { %714 = vst [vmem:[%s1266_s3 + $0x60] sm:$0xff] %v666_v43  ;;  %v931_v44 = vpop.f32.mrb[14].mxu1 }
 0x24f   : > { %v689_v45 = vpack.c.bf16 %v931_v44, %v930_v42  ;;  %717 = vst [vmem:[%s1266_s3 + $0x78] sm:$0xff] %v931_v44  ;;  %v669_v46 = vpop.f32.mrb[15].mxu1 }
 0x250   : > { %v688_v47 = vpack.c.bf16 %v669_v46, %v666_v43  ;;  %715 = vst [vmem:[%s1266_s3 + $0x68] sm:$0xff] %v669_v46 }
 0x251   : > { %701 = vst [vmem:[#allocation2 + $0x38] sm:$0xff] %v689_v45 }
 0x252   : > { %700 = vst [vmem:[#allocation2 + $0x30] sm:$0xff] %v688_v47 }
 0x253 PF: > { %s13_s14 = sadd.s32 1, %s1034_s14   ;;  %s1267_s12 = smov %s1030_s13 }
 0x254   : > { %p10_p8 = scmp.ge.s32.totalorder %s13_s14, 5   ;;  %s1268_s13 = smov %s1270_s15 }
 0x256   :  { %12 = sbr.rel (!%p10_p8) target bundleno = 2 (0x2), region = 82 }

</bundles_post_ra>
